<compile_context>
chip_gen: v7x
topology: tpu7x:2x2x1
jax: 0.10.0
libtpu: 0.0.40
codegen_flags: <defaults>
</compile_context>

<pallas_src>
import jax
import jax.numpy as jnp
from jax.experimental import pallas as pl
from jax.experimental.pallas import tpu as pltpu


def _round_up(n, m):
    return ((n + m - 1) // m) * m


def _pick_tile(n, align, max_tile):
    """Largest multiple of `align` that divides `n` and is <= max_tile."""
    best = align
    t = align
    limit = min(n, max_tile)
    while t <= limit:
        if n % t == 0:
            best = t
        t += align
    return best


def _make_pool_kernel(hw_true, hw_tile, need_mask):
    def pool_kernel(x_ref, sum_ref, max_ref, acc_sum, acc_max):
        h = pl.program_id(1)

        @pl.when(h == 0)
        def _():
            acc_sum[...] = jnp.zeros_like(acc_sum)
            acc_max[...] = jnp.full_like(acc_max, -jnp.inf)

        x = x_ref[...]
        if need_mask:
            lane = jax.lax.broadcasted_iota(jnp.int32, x.shape, dimension=1)
            valid = (h * hw_tile + lane) < hw_true
            x_sum = jnp.where(valid, x, jnp.zeros((), x.dtype))
            x_max = jnp.where(valid, x, jnp.asarray(-jnp.inf, x.dtype))
        else:
            x_sum = x
            x_max = x

        # f32 accumulation without materializing an upcast copy of the tile.
        acc_sum[...] += jnp.sum(x_sum, axis=-1, keepdims=True, dtype=jnp.float32)
        acc_max[...] = jnp.maximum(
            acc_max[...],
            jnp.max(x_max, axis=-1, keepdims=True).astype(jnp.float32))

        @pl.when(h == pl.num_programs(1) - 1)
        def _():
            sum_ref[...] = acc_sum[...]
            max_ref[...] = acc_max[...]

    return pool_kernel


def _scale_kernel(x_ref, s_ref, o_ref):
    x = x_ref[...]
    o_ref[...] = x * s_ref[...].astype(x.dtype)


def channel_gate(x, w1, b1, w2, b2):
    """x: (B, C, H, W). Weights use (in, out) layout: w1 (C,R), w2 (R,C)."""
    B, C, H, W = x.shape
    rows, HW = B * C, H * W

    # ---- tile selection: lane-dense, divisor-based to minimize padding ----
    HW_p = _round_up(HW, 128)
    hw_tile = _pick_tile(HW_p, 128, 2048)
    if hw_tile < 512 and HW_p > 512:
        # Pad a bit more along HW to unlock a lane-dense (>=512) tile.
        HW_p = _round_up(HW, 512)
        hw_tile = _pick_tile(HW_p, 128, 2048)

    rows_p = _round_up(rows, 8)
    row_tile = _pick_tile(rows_p, 8, 256)
    if row_tile < 64 and rows_p > 64:
        rows_p = _round_up(rows, 64)
        row_tile = _pick_tile(rows_p, 8, 256)

    x2 = x.reshape(rows, HW)
    if rows_p != rows or HW_p != HW:
        x2 = jnp.pad(x2, ((0, rows_p - rows), (0, HW_p - HW)))

    n_row = rows_p // row_tile
    n_hw = HW_p // hw_tile

    # ---- pass 1: tiled global sum / max pooling over HW -------------------
    pool_kernel = _make_pool_kernel(HW, hw_tile, HW_p != HW)
    sum_out, max_out = pl.pallas_call(
        pool_kernel,
        out_shape=(jax.ShapeDtypeStruct((rows_p, 1), jnp.float32),
                   jax.ShapeDtypeStruct((rows_p, 1), jnp.float32)),
        grid=(n_row, n_hw),
        in_specs=[pl.BlockSpec((row_tile, hw_tile), lambda r, h: (r, h))],
        out_specs=(pl.BlockSpec((row_tile, 1), lambda r, h: (r, 0)),
                   pl.BlockSpec((row_tile, 1), lambda r, h: (r, 0))),
        scratch_shapes=[pltpu.VMEM((row_tile, 1), jnp.float32),
                        pltpu.VMEM((row_tile, 1), jnp.float32)],
        compiler_params=pltpu.CompilerParams(
            dimension_semantics=("parallel", "arbitrary")),
    )(x2)

    # ---- tiny gate MLP + sigmoid off the hot path (plain JAX) -------------
    avg_pool = sum_out[:rows, 0].reshape(B, C) * (1.0 / float(HW))
    max_pool = max_out[:rows, 0].reshape(B, C)
    pooled = jnp.concatenate([avg_pool, max_pool], axis=0)          # (2B, C)
    hidden = jnp.maximum(pooled @ w1 + b1, 0.0)                     # (2B, R)
    att = hidden @ w2 + b2                                          # (2B, C)
    scale = jax.nn.sigmoid(att[:B] + att[B:])                       # (B, C)

    scale2 = scale.reshape(rows, 1).astype(jnp.float32)
    if rows_p != rows:
        scale2 = jnp.pad(scale2, ((0, rows_p - rows), (0, 0)))

    # ---- pass 2: streaming x * scale (memory-bound, double-buffered) ------
    out2 = pl.pallas_call(
        _scale_kernel,
        out_shape=jax.ShapeDtypeStruct((rows_p, HW_p), x.dtype),
        grid=(n_row, n_hw),
        in_specs=[pl.BlockSpec((row_tile, hw_tile), lambda r, h: (r, h)),
                  pl.BlockSpec((row_tile, 1), lambda r, h: (r, 0))],
        out_specs=pl.BlockSpec((row_tile, hw_tile), lambda r, h: (r, h)),
        compiler_params=pltpu.CompilerParams(
            dimension_semantics=("parallel", "parallel")),
    )(x2, scale2)

    if rows_p != rows or HW_p != HW:
        out2 = out2[:rows, :HW]
    return out2.reshape(B, C, H, W)


def _reference(x, w1, b1, w2, b2):
    avg = jnp.mean(x, axis=(2, 3))
    mx = jnp.max(x, axis=(2, 3))

    def mlp(p):
        h = jnp.maximum(p @ w1 + b1, 0.0)
        return h @ w2 + b2

    att = mlp(avg) + mlp(mx)
    scale = jax.nn.sigmoid(att)[:, :, None, None]
    return x * scale


if __name__ == "__main__":
    B, C, H, W = 2, 4, 16, 16     # gate_channels = 4
    R = 2                         # reduction_channel = 2

    key = jax.random.PRNGKey(0)
    kx, k1, kb1, k2, kb2 = jax.random.split(key, 5)

    x = jax.random.normal(kx, (B, C, H, W), dtype=jnp.float32)

    # Deterministic Linear init (PyTorch-style uniform bounds), (in, out) layout.
    bound1 = 1.0 / jnp.sqrt(C)
    w1 = jax.random.uniform(k1, (C, R), minval=-bound1, maxval=bound1, dtype=jnp.float32)
    b1 = jax.random.uniform(kb1, (R,), minval=-bound1, maxval=bound1, dtype=jnp.float32)
    bound2 = 1.0 / jnp.sqrt(R)
    w2 = jax.random.uniform(k2, (R, C), minval=-bound2, maxval=bound2, dtype=jnp.float32)
    b2 = jax.random.uniform(kb2, (C,), minval=-bound2, maxval=bound2, dtype=jnp.float32)

    channel_gate_jit = jax.jit(channel_gate)
    out = channel_gate_jit(x, w1, b1, w2, b2)
    out = jax.block_until_ready(out)

    ref = _reference(x, w1, b1, w2, b2)
    assert out.shape == (B, C, H, W)
    assert jnp.allclose(out, ref, atol=1e-5, rtol=1e-5)

    print("KERNEL_OK")
</pallas_src>

<mosaic_0001>
module attributes {stable_mosaic.version = 11 : i64} {
  func.func @pool_kernel(%arg0: i32, %arg1: i32, %arg2: memref<8x256xf32, #tpu.memory_space<vmem>>, %arg3: memref<8x1xf32, #tpu.memory_space<vmem>>, %arg4: memref<8x1xf32, #tpu.memory_space<vmem>>, %arg5: memref<8x1xf32, #tpu.memory_space<vmem>>, %arg6: memref<8x1xf32, #tpu.memory_space<vmem>>) attributes {dimension_semantics = [#tpu.dimension_semantics<parallel>, #tpu.dimension_semantics<arbitrary>], iteration_bounds = array<i64: 1, 1>, scalar_prefetch = 0 : i64, scratch_operands = 2 : i64, tpu.core_type = #tpu.core_type<tc>, window_params = [{transform_indices = @transform_0, window_bounds = array<i64: 8, 256>}, {transform_indices = @transform_1, window_bounds = array<i64: 8, 1>}, {transform_indices = @transform_2, window_bounds = array<i64: 8, 1>}]} {
    %c0_i32 = arith.constant 0 : i32
    %0 = arith.cmpi eq, %arg1, %c0_i32 : i32
    %1 = arith.extui %0 : i1 to i32
    %c0_i32_0 = arith.constant 0 : i32
    %2 = arith.cmpi ne, %1, %c0_i32_0 : i32
    scf.if %2 {
      %cst_13 = arith.constant 0.000000e+00 : f32
      %17 = vector.broadcast %cst_13 : f32 to vector<8x1xf32>
      %c0_14 = arith.constant 0 : index
      %c0_15 = arith.constant 0 : index
      %18 = vector.load %arg5[%c0_14, %c0_15] : memref<8x1xf32, #tpu.memory_space<vmem>>, vector<8x1xf32>
      tpu.vector_store %arg5[%c0_14, %c0_15], %17 {strides = array<i32>} : memref<8x1xf32, #tpu.memory_space<vmem>>, vector<8x1xf32>,
      %cst_16 = arith.constant 0xFF800000 : f32
      %19 = vector.broadcast %cst_16 : f32 to vector<8x1xf32>
      %c0_17 = arith.constant 0 : index
      %c0_18 = arith.constant 0 : index
      %20 = vector.load %arg6[%c0_17, %c0_18] : memref<8x1xf32, #tpu.memory_space<vmem>>, vector<8x1xf32>
      tpu.vector_store %arg6[%c0_17, %c0_18], %19 {strides = array<i32>} : memref<8x1xf32, #tpu.memory_space<vmem>>, vector<8x1xf32>,
    } else {
    }
    %c0 = arith.constant 0 : index
    %c0_1 = arith.constant 0 : index
    %3 = vector.load %arg2[%c0, %c0_1] : memref<8x256xf32, #tpu.memory_space<vmem>>, vector<8x256xf32>
    %c0_2 = arith.constant 0 : index
    %c0_3 = arith.constant 0 : index
    %4 = vector.load %arg5[%c0_2, %c0_3] : memref<8x1xf32, #tpu.memory_space<vmem>>, vector<8x1xf32>
    %cst = arith.constant dense<0.000000e+00> : vector<8xf32>
    %5 = vector.multi_reduction <add>, %3, %cst [1] : vector<8x256xf32> to vector<8xf32>
    %6 = vector.shape_cast %5 : vector<8xf32> to vector<8x1xf32>
    %7 = arith.addf %4, %6 : vector<8x1xf32>
    %c0_4 = arith.constant 0 : index
    %c0_5 = arith.constant 0 : index
    %8 = vector.load %arg5[%c0_4, %c0_5] : memref<8x1xf32, #tpu.memory_space<vmem>>, vector<8x1xf32>
    tpu.vector_store %arg5[%c0_4, %c0_5], %7 {strides = array<i32>} : memref<8x1xf32, #tpu.memory_space<vmem>>, vector<8x1xf32>,
    %c0_6 = arith.constant 0 : index
    %c0_7 = arith.constant 0 : index
    %9 = vector.load %arg6[%c0_6, %c0_7] : memref<8x1xf32, #tpu.memory_space<vmem>>, vector<8x1xf32>
    %cst_8 = arith.constant dense<0xFF800000> : vector<8xf32>
    %10 = vector.multi_reduction <maximumf>, %3, %cst_8 [1] : vector<8x256xf32> to vector<8xf32>
    %11 = vector.shape_cast %10 : vector<8xf32> to vector<8x1xf32>
    %12 = arith.maximumf %9, %11 : vector<8x1xf32>
    %c0_9 = arith.constant 0 : index
    %c0_10 = arith.constant 0 : index
    %13 = vector.load %arg6[%c0_9, %c0_10] : memref<8x1xf32, #tpu.memory_space<vmem>>, vector<8x1xf32>
    tpu.vector_store %arg6[%c0_9, %c0_10], %12 {strides = array<i32>} : memref<8x1xf32, #tpu.memory_space<vmem>>, vector<8x1xf32>,
    %c0_i32_11 = arith.constant 0 : i32
    %14 = arith.cmpi eq, %arg1, %c0_i32_11 : i32
    %15 = arith.extui %14 : i1 to i32
    %c0_i32_12 = arith.constant 0 : i32
    %16 = arith.cmpi ne, %15, %c0_i32_12 : i32
    scf.if %16 {
      %c0_13 = arith.constant 0 : index
      %c0_14 = arith.constant 0 : index
      %17 = vector.load %arg5[%c0_13, %c0_14] : memref<8x1xf32, #tpu.memory_space<vmem>>, vector<8x1xf32>
      %c0_15 = arith.constant 0 : index
      %c0_16 = arith.constant 0 : index
      %18 = vector.load %arg3[%c0_15, %c0_16] : memref<8x1xf32, #tpu.memory_space<vmem>>, vector<8x1xf32>
      tpu.vector_store %arg3[%c0_15, %c0_16], %17 {strides = array<i32>} : memref<8x1xf32, #tpu.memory_space<vmem>>, vector<8x1xf32>,
      %c0_17 = arith.constant 0 : index
      %c0_18 = arith.constant 0 : index
      %19 = vector.load %arg6[%c0_17, %c0_18] : memref<8x1xf32, #tpu.memory_space<vmem>>, vector<8x1xf32>
      %c0_19 = arith.constant 0 : index
      %c0_20 = arith.constant 0 : index
      %20 = vector.load %arg4[%c0_19, %c0_20] : memref<8x1xf32, #tpu.memory_space<vmem>>, vector<8x1xf32>
      tpu.vector_store %arg4[%c0_19, %c0_20], %19 {strides = array<i32>} : memref<8x1xf32, #tpu.memory_space<vmem>>, vector<8x1xf32>,
    } else {
    }
    return
  }
  func.func @transform_0(%arg0: i32, %arg1: i32) -> (i32, i32) {
    %c0_i32 = arith.constant 0 : i32
    return %arg0, %arg1 : i32, i32
  }
  func.func @transform_1(%arg0: i32, %arg1: i32) -> (i32, i32) {
    %c0_i32 = arith.constant 0 : i32
    %c0_i32_0 = arith.constant 0 : i32
    return %arg0, %c0_i32 : i32, i32
  }
  func.func @transform_2(%arg0: i32, %arg1: i32) -> (i32, i32) {
    %c0_i32 = arith.constant 0 : i32
    %c0_i32_0 = arith.constant 0 : i32
    return %arg0, %c0_i32 : i32, i32
  }
}

module attributes {stable_mosaic.version = 11 : i64} {
  func.func @_scale_kernel(%arg0: i32, %arg1: i32, %arg2: memref<8x256xf32, #tpu.memory_space<vmem>>, %arg3: memref<8x1xf32, #tpu.memory_space<vmem>>, %arg4: memref<8x256xf32, #tpu.memory_space<vmem>>) attributes {dimension_semantics = [#tpu.dimension_semantics<parallel>, #tpu.dimension_semantics<parallel>], iteration_bounds = array<i64: 1, 1>, scalar_prefetch = 0 : i64, scratch_operands = 0 : i64, tpu.core_type = #tpu.core_type<tc>, window_params = [{transform_indices = @transform_0, window_bounds = array<i64: 8, 256>}, {transform_indices = @transform_1, window_bounds = array<i64: 8, 1>}, {transform_indices = @transform_2, window_bounds = array<i64: 8, 256>}]} {
    %c0 = arith.constant 0 : index
    %c0_0 = arith.constant 0 : index
    %0 = vector.load %arg2[%c0, %c0_0] : memref<8x256xf32, #tpu.memory_space<vmem>>, vector<8x256xf32>
    %c0_1 = arith.constant 0 : index
    %c0_2 = arith.constant 0 : index
    %1 = vector.load %arg3[%c0_1, %c0_2] : memref<8x1xf32, #tpu.memory_space<vmem>>, vector<8x1xf32>
    %2 = vector.broadcast %1 : vector<8x1xf32> to vector<8x256xf32>
    %3 = arith.mulf %0, %2 : vector<8x256xf32>
    %c0_3 = arith.constant 0 : index
    %c0_4 = arith.constant 0 : index
    %4 = vector.load %arg4[%c0_3, %c0_4] : memref<8x256xf32, #tpu.memory_space<vmem>>, vector<8x256xf32>
    tpu.vector_store %arg4[%c0_3, %c0_4], %3 {strides = array<i32>} : memref<8x256xf32, #tpu.memory_space<vmem>>, vector<8x256xf32>,
    return
  }
  func.func @transform_0(%arg0: i32, %arg1: i32) -> (i32, i32) {
    %c0_i32 = arith.constant 0 : i32
    return %arg0, %arg1 : i32, i32
  }
  func.func @transform_1(%arg0: i32, %arg1: i32) -> (i32, i32) {
    %c0_i32 = arith.constant 0 : i32
    %c0_i32_0 = arith.constant 0 : i32
    return %arg0, %c0_i32 : i32, i32
  }
  func.func @transform_2(%arg0: i32, %arg1: i32) -> (i32, i32) {
    %c0_i32 = arith.constant 0 : i32
    return %arg0, %arg1 : i32, i32
  }
}

</mosaic_0001>

<bundles_post_ra>
// kernel: channel_gate.2
= control target key start
LH: loop header
LB: loop body
LE: loop exit
PB: predicated region body
PF: predicated region fallthrough
CT: control target
= control target key end

     0   :  { %vm14_vm0 = vcmask 7168   ;;  %v49_v2 = vmov 0.0   ;;  %v50_v5 = vmov -inf   ;;  %s84_s0 = inlined_call_operand.vmem [shape: f32[8,256], index: 0, kind: input, shape index: {}]   ;;  %s85_s1 = inlined_call_operand.vmem [shape: f32[8,1], index: 1, kind: output, shape index: {0}]   ;;  %s86_s2 = inlined_call_operand.vmem [shape: f32[8,1], index: 2, kind: output, shape index: {1}]  }
   0x1   :  { %v17_v0 = vld [vmem:[%s84_s0] sm:$0xff]  ;;  %v18_v1 = vld [vmem:[%s84_s0 + $0x8] sm:$0xff]  ;;  %15 = vst.msk [vmem:[#allocation2] sm:$0xff] %vm14_vm0, %v49_v2  ;;  %16 = vst.msk [vmem:[#allocation3] sm:$0xff] %vm14_vm0, %v50_v5 }
   0x2   :  { %v20_v3 = vadd.f32 %v18_v1, %v17_v0  ;;  %v27_v4 = vmax.f32 %v17_v0, %v18_v1 }
   0x4   :  { %21 = vadd.xlane.f32.xlu0 %v20_v3 }
   0x8   :  { %28 = vmax.xlane.f32.xlu0 %v27_v4  ;;  %v19_v6 = vld [vmem:[#allocation2] sm:$0xff]  ;;  %v26_v9 = vld [vmem:[#allocation3] sm:$0xff] }
  0x91   :  { %v22_v7 = vpop.xlane.xlu0 %21 }
  0x92   :  { %v23_v8 = vadd.f32 %v22_v7, %v19_v6 }
  0x94   :  { %25 = vst.msk [vmem:[#allocation2] sm:$0xff] %vm14_vm0, %v23_v8 }
  0x95   :  { %v29_v10 = vpop.xlane.xlu0 %28 }
  0x96   :  { %v30_v11 = vmax.f32 %v26_v9, %v29_v10 }
  0x98   :  { %31 = vst.msk [vmem:[#allocation3] sm:$0xff] %vm14_vm0, %v30_v11 }
  0x9b   :  { %v35_v12 = vld [vmem:[#allocation2] sm:$0xff] }
  0x9c   :  { %36 = vst.msk [vmem:[%s85_s1] sm:$0xff] %vm14_vm0, %v35_v12 }
  0x9f   :  { %v37_v13 = vld [vmem:[#allocation3] sm:$0xff] }
  0xa0   :  { %38 = vst.msk [vmem:[%s86_s2] sm:$0xff] %vm14_vm0, %v37_v13 }

// kernel: channel_gate.3
= control target key start
LH: loop header
LB: loop body
LE: loop exit
PB: predicated region body
PF: predicated region fallthrough
CT: control target
= control target key end

     0   :  { %v29_v0 = vmov 0   ;;  %s60_s1 = inlined_call_operand.vmem [shape: f32[8,1], index: 1, kind: input, shape index: {}]   ;;  %s61_s0 = inlined_call_operand.vmem [shape: f32[8,256], index: 0, kind: input, shape index: {}]   ;;  %s62_s2 = inlined_call_operand.vmem [shape: f32[8,256], index: 2, kind: output, shape index: {}]  }
   0x1   :  { %28 = vset.pattern.permute.xlu0 %v29_v0  ;;  %v13_v1 = vld [vmem:[%s60_s1] sm:$0xff]  ;;  %v12_v3 = vld [vmem:[%s61_s0 + $0x8] sm:$0xff] }
   0x2   :  { %16 = vperm.xlu0 %28, %v13_v1   ;;  %v11_v2 = vld [vmem:[%s61_s0] sm:$0xff] }
  0x81   :  { %v17_v4 = vpop.permute.xlu0 %16 }
  0x82   :  { %v19_v5 = vmul.f32 %v17_v4, %v11_v2  ;;  %v20_v6 = vmul.f32 %v17_v4, %v12_v3 }
  0x84   :  { %21 = vst [vmem:[%s62_s2] sm:$0xff] %v19_v5  ;;  %22 = vst [vmem:[%s62_s2 + $0x8] sm:$0xff] %v20_v6 }

</bundles_post_ra>
